<compile_context>
chip_gen: v6e
topology: v6e:2x2x1
jax: 0.10.0
libtpu: 0.0.40
codegen_flags: <defaults>
</compile_context>

<pallas_src>
import functools

import numpy as np
import jax
import jax.numpy as jnp
from jax.experimental import pallas as pl
from jax.experimental.pallas import tpu as pltpu


_NORM_EPS_SQ = 1e-24  # (1e-12)**2, matches F.normalize eps=1e-12


def _round_up(x, m):
    return (x + m - 1) // m * m


def _tower(x, w1, b1, w2, b2, cdt):
    """Linear -> Sigmoid -> (Dropout=identity) -> Linear -> row L2-normalize.

    Matmul operands are cast to `cdt` (bf16 by default -> native MXU rate);
    accumulation, bias add, sigmoid and normalization stay in f32.
    """
    h = jax.nn.sigmoid(
        jnp.dot(x.astype(cdt), w1, preferred_element_type=jnp.float32) + b1)
    e = jnp.dot(h.astype(cdt), w2, preferred_element_type=jnp.float32) + b2
    # F.normalize: v / max(||v||, 1e-12) == v * rsqrt(max(||v||^2, 1e-24))
    inv = jax.lax.rsqrt(
        jnp.maximum(jnp.sum(e * e, axis=1, keepdims=True), _NORM_EPS_SQ))
    return e * inv


def _write_outputs(ue, ie, uemb_ref, iemb_ref, score_ref):
    uemb_ref[...] = ue.astype(uemb_ref.dtype)
    iemb_ref[...] = ie.astype(iemb_ref.dtype)
    s = jax.nn.sigmoid(jnp.sum(ue * ie, axis=1))          # (tb,), f32
    if score_ref.shape[0] == 1:                            # lane-dense (1, tb)
        score_ref[...] = s[None, :].astype(score_ref.dtype)
    else:                                                  # (tb, 1) fallback
        score_ref[...] = s[:, None].astype(score_ref.dtype)


def _mf_fused_kernel(
    uidx_ref, iidx_ref,                    # (tb, 1) int32 row ids
    ufeat_ref, ifeat_ref,                  # full tables, VMEM resident, compute dtype
    w1u_ref, b1u_ref, w2u_ref, b2u_ref,    # user MLP params (weights in compute dtype)
    w1i_ref, b1i_ref, w2i_ref, b2i_ref,    # item MLP params
    uemb_ref, iemb_ref, score_ref,         # outputs
):
    tb = uidx_ref.shape[0]
    cdt = ufeat_ref.dtype
    n_u = ufeat_ref.shape[0]
    n_i = ifeat_ref.shape[0]
    # In-kernel row gather as a one-hot matmul built directly in the narrow
    # compute dtype (only used when tables are small; see fuse_gather heuristic).
    # NOTE: out-of-range indices select nothing (bias-only embedding) instead of
    # raising like torch's indexing would.
    u_oh = (uidx_ref[...] ==
            jax.lax.broadcasted_iota(jnp.int32, (tb, n_u), 1)).astype(cdt)
    i_oh = (iidx_ref[...] ==
            jax.lax.broadcasted_iota(jnp.int32, (tb, n_i), 1)).astype(cdt)
    uf = jnp.dot(u_oh, ufeat_ref[...], preferred_element_type=jnp.float32)
    itf = jnp.dot(i_oh, ifeat_ref[...], preferred_element_type=jnp.float32)

    ue = _tower(uf, w1u_ref[...], b1u_ref[...], w2u_ref[...], b2u_ref[...], cdt)
    ie = _tower(itf, w1i_ref[...], b1i_ref[...], w2i_ref[...], b2i_ref[...], cdt)
    _write_outputs(ue, ie, uemb_ref, iemb_ref, score_ref)


def _mf_gathered_kernel(
    uf_ref, if_ref,                        # pre-gathered features (tb,Fu),(tb,Fi)
    w1u_ref, b1u_ref, w2u_ref, b2u_ref,
    w1i_ref, b1i_ref, w2i_ref, b2i_ref,
    uemb_ref, iemb_ref, score_ref,
):
    cdt = uf_ref.dtype
    ue = _tower(uf_ref[...], w1u_ref[...], b1u_ref[...], w2u_ref[...],
                b2u_ref[...], cdt)
    ie = _tower(if_ref[...], w1i_ref[...], b1i_ref[...], w2i_ref[...],
                b2i_ref[...], cdt)
    _write_outputs(ue, ie, uemb_ref, iemb_ref, score_ref)


@functools.partial(
    jax.jit,
    static_argnames=("tile_b", "out_dtype", "compute_dtype", "fuse_gather"))
def mf_forward(users, items, user_features, item_features, params, *,
               tile_b=512, out_dtype=jnp.float32, compute_dtype=jnp.bfloat16,
               fuse_gather=None):
    """Returns (score[B], user_embeddings[B,H], item_embeddings[B,H])."""
    B = users.shape[0]
    n_u, Fu = user_features.shape
    n_i, Fi = item_features.shape
    H = params["w2u"].shape[1]
    cd_itemsize = np.dtype(compute_dtype).itemsize
    od_itemsize = np.dtype(out_dtype).itemsize

    # Fuse the row gather into the kernel only where the one-hot gather is
    # actually cheaper than a wrapper gather and the resident tables stay small
    # (leaves headroom under v7x's 64 MiB VMEM; v5e/v6e have 128 MiB).
    if fuse_gather is None:
        table_bytes = (n_u * Fu + n_i * Fi) * cd_itemsize
        fuse_gather = (table_bytes <= (8 << 20)) and max(n_u, n_i) <= 1024

    # Batch tile: large (amortizes ~0.35us/grid-step pipeline overhead, fills the
    # MXU M dimension), multiple of 8 (f32 sublane), capped at the padded batch.
    tb = max(8, min(_round_up(tile_b, 8), _round_up(B, 8)))
    # Guarantee >= 2 grid steps for non-trivial batches so the "parallel" axis
    # can span both v7x TensorCores (no effect on single-TC v5e/v6e).
    if _round_up(B, tb) == tb and B >= 16:
        tb = max(8, _round_up((B + 1) // 2, 8))
    B_pad = _round_up(B, tb)
    grid = (B_pad // tb,)
    num_tiles = grid[0]

    # Weights cast to the narrow compute dtype (native MXU rate); biases stay
    # f32 and are added to the f32 accumulator.
    wcast = lambda k: params[k].astype(compute_dtype)
    bcast = lambda k: params[k].astype(jnp.float32)
    weight_args = (wcast("w1u"), bcast("b1u"), wcast("w2u"), bcast("b2u"),
                   wcast("w1i"), bcast("b1i"), wcast("w2i"), bcast("b2i"))

    def batch_spec(cols):
        return pl.BlockSpec((tb, cols), lambda b: (b, 0))

    def resident_spec(shape):
        # Constant index_map -> block fetched once, stays resident across steps.
        return pl.BlockSpec(shape, lambda b: (0, 0))

    weight_specs = [resident_spec(w.shape) for w in weight_args]

    # Score output: lane-dense (1, tb) blocks whenever legal, else (tb, 1).
    lane_dense_score = (num_tiles == 1) or (tb % 128 == 0)
    if lane_dense_score:
        score_shape = jax.ShapeDtypeStruct((1, B_pad), jnp.float32)
        score_spec = pl.BlockSpec((1, tb), lambda b: (0, b))
    else:
        score_shape = jax.ShapeDtypeStruct((B_pad, 1), jnp.float32)
        score_spec = pl.BlockSpec((tb, 1), lambda b: (b, 0))

    out_shape = (jax.ShapeDtypeStruct((B_pad, H), out_dtype),
                 jax.ShapeDtypeStruct((B_pad, H), out_dtype),
                 score_shape)
    out_specs = [batch_spec(H), batch_spec(H), score_spec]

    # VMEM budget: actual footprint (double-buffered) with slack, capped at
    # 48 MiB so v7x keeps headroom for compiler-internal scratch.
    def nbytes(x):
        return int(np.prod(x.shape)) * np.dtype(x.dtype).itemsize

    resident_bytes = sum(nbytes(w) for w in weight_args)
    if fuse_gather:
        resident_bytes += (n_u * Fu + n_i * Fi) * cd_itemsize
        stream_bytes = 2 * tb * 4                                # index blocks
        temp_bytes = 2 * tb * (n_u + n_i) * cd_itemsize          # one-hot temps
    else:
        stream_bytes = tb * (Fu + Fi) * cd_itemsize              # feature blocks
        temp_bytes = 0
    out_bytes = tb * (2 * H * od_itemsize + 4)
    est = 2 * resident_bytes + 2 * (stream_bytes + out_bytes) + temp_bytes
    vmem_limit = int(min(48 << 20, max(32 << 20, 2 * est)))

    compiler_params = pltpu.CompilerParams(
        dimension_semantics=("parallel",),
        vmem_limit_bytes=vmem_limit,
    )

    def pad_rows(x):
        if B_pad != B:
            x = jnp.pad(x, ((0, B_pad - B), (0, 0)))
        return x

    if fuse_gather:
        uidx = pad_rows(users.astype(jnp.int32).reshape(-1, 1))
        iidx = pad_rows(items.astype(jnp.int32).reshape(-1, 1))
        in_specs = [batch_spec(1), batch_spec(1),
                    resident_spec(user_features.shape),
                    resident_spec(item_features.shape)] + weight_specs
        args = (uidx, iidx,
                user_features.astype(compute_dtype),
                item_features.astype(compute_dtype),
                *weight_args)
        kernel = _mf_fused_kernel
    else:
        # TODO(synk): for tables too large for VMEM residency the gather stays in
        # XLA; an in-kernel DMA gather (memory_space=pl.ANY tables + per-row
        # make_async_copy driven by scalar-prefetched indices) would remove this
        # extra HBM pass but is not implemented here.
        uf = pad_rows(user_features[users].astype(compute_dtype))
        itf = pad_rows(item_features[items].astype(compute_dtype))
        in_specs = [batch_spec(Fu), batch_spec(Fi)] + weight_specs
        args = (uf, itf, *weight_args)
        kernel = _mf_gathered_kernel

    uemb, iemb, score2d = pl.pallas_call(
        kernel,
        out_shape=out_shape,
        grid_spec=pltpu.PrefetchScalarGridSpec(
            num_scalar_prefetch=0,
            grid=grid,
            in_specs=in_specs,
            out_specs=out_specs,
        ),
        compiler_params=compiler_params,
    )(*args)

    score = score2d[0] if lane_dense_score else score2d[:, 0]
    if B_pad != B:
        uemb, iemb, score = uemb[:B], iemb[:B], score[:B]
    return score, uemb, iemb


def init_params(key, n_user_features, n_item_features, n_hidden):
    """PyTorch-Linear-style init U(-1/sqrt(fan_in), 1/sqrt(fan_in)).
    Weights stored as (in_features, out_features)."""
    ks = jax.random.split(key, 8)

    def linear(kw, kb, fan_in, fan_out):
        bound = 1.0 / jnp.sqrt(jnp.float32(fan_in))
        w = jax.random.uniform(kw, (fan_in, fan_out), jnp.float32, -bound, bound)
        b = jax.random.uniform(kb, (1, fan_out), jnp.float32, -bound, bound)
        return w, b

    w1u, b1u = linear(ks[0], ks[1], n_user_features, n_hidden)
    w2u, b2u = linear(ks[2], ks[3], n_hidden, n_hidden)
    w1i, b1i = linear(ks[4], ks[5], n_item_features, n_hidden)
    w2i, b2i = linear(ks[6], ks[7], n_hidden, n_hidden)
    return dict(w1u=w1u, b1u=b1u, w2u=w2u, b2u=b2u,
                w1i=w1i, b1i=b1i, w2i=w2i, b2i=b2i)


def mf_forward_ref(users, items, user_features, item_features, params):
    """Pure-JAX f32 reference (eval mode, dropout = identity), mirrors torch."""
    uf = user_features[users]
    itf = item_features[items]

    def tower(x, w1, b1, w2, b2):
        h = jax.nn.sigmoid(x @ w1 + b1)
        e = h @ w2 + b2
        n = jnp.maximum(jnp.linalg.norm(e, axis=1, keepdims=True), 1e-12)
        return e / n

    ue = tower(uf, params["w1u"], params["b1u"], params["w2u"], params["b2u"])
    ie = tower(itf, params["w1i"], params["b1i"], params["w2i"], params["b2i"])
    score = jax.nn.sigmoid(jnp.sum(ue * ie, axis=1))
    return score, ue, ie


if __name__ == "__main__":
    root_key = jax.random.PRNGKey(0)

    def make_case(key, n_users, n_items, fu, fi, hidden, batch):
        k_uf, k_if, k_u, k_i, k_p = jax.random.split(key, 5)
        user_features = jax.random.normal(k_uf, (n_users, fu), jnp.float32)
        item_features = jax.random.normal(k_if, (n_items, fi), jnp.float32)
        users = jax.random.randint(k_u, (batch,), 0, n_users)
        items = jax.random.randint(k_i, (batch,), 0, n_items)
        params = init_params(k_p, fu, fi, hidden)
        return users, items, user_features, item_features, params

    def check(case, tol, **kwargs):
        users, items, ufeat, ifeat, params = case
        score, ue, ie = mf_forward(users, items, ufeat, ifeat, params, **kwargs)
        jax.block_until_ready((score, ue, ie))
        score_r, ue_r, ie_r = mf_forward_ref(users, items, ufeat, ifeat, params)
        assert jnp.allclose(score.astype(jnp.float32), score_r,
                            atol=tol, rtol=tol), "score mismatch"
        assert jnp.allclose(ue.astype(jnp.float32), ue_r,
                            atol=tol, rtol=tol), "user embedding mismatch"
        assert jnp.allclose(ie.astype(jnp.float32), ie_r,
                            atol=tol, rtol=tol), "item embedding mismatch"

    k_small, k_big = jax.random.split(root_key)

    # Small case: strict f32 parity through both gather paths (single grid step).
    small = make_case(k_small, 20, 30, 16, 24, 32, 8)
    check(small, tol=1e-4, compute_dtype=jnp.float32)
    check(small, tol=1e-4, compute_dtype=jnp.float32, fuse_gather=False)

    # Larger case: default bf16 compute + bf16 embedding outputs, fused in-kernel
    # gather, multi-step grid, lane-dense H=128 embedding and (1, tb) score stores.
    big = make_case(k_big, 300, 500, 48, 64, 128, 1024)
    check(big, tol=2e-2, out_dtype=jnp.bfloat16)

    # Same big case, strict f32 through the wrapper-gather fallback path.
    check(big, tol=1e-4, compute_dtype=jnp.float32, fuse_gather=False)

    print("KERNEL_OK")
</pallas_src>

<mosaic_0001>
module attributes {stable_mosaic.version = 11 : i64} {
  func.func @_mf_fused_kernel(%arg0: i32, %arg1: memref<8x1xi32, #tpu.memory_space<vmem>>, %arg2: memref<8x1xi32, #tpu.memory_space<vmem>>, %arg3: memref<20x16xf32, #tpu.memory_space<vmem>>, %arg4: memref<30x24xf32, #tpu.memory_space<vmem>>, %arg5: memref<16x32xf32, #tpu.memory_space<vmem>>, %arg6: memref<1x32xf32, #tpu.memory_space<vmem>>, %arg7: memref<32x32xf32, #tpu.memory_space<vmem>>, %arg8: memref<1x32xf32, #tpu.memory_space<vmem>>, %arg9: memref<24x32xf32, #tpu.memory_space<vmem>>, %arg10: memref<1x32xf32, #tpu.memory_space<vmem>>, %arg11: memref<32x32xf32, #tpu.memory_space<vmem>>, %arg12: memref<1x32xf32, #tpu.memory_space<vmem>>, %arg13: memref<8x32xf32, #tpu.memory_space<vmem>>, %arg14: memref<8x32xf32, #tpu.memory_space<vmem>>, %arg15: memref<1x8xf32, #tpu.memory_space<vmem>>) attributes {dimension_semantics = [#tpu.dimension_semantics<parallel>], iteration_bounds = array<i64: 1>, scalar_prefetch = 0 : i64, scratch_operands = 0 : i64, tpu.core_type = #tpu.core_type<tc>, window_params = [{transform_indices = @transform_0, window_bounds = array<i64: 8, 1>}, {transform_indices = @transform_1, window_bounds = array<i64: 8, 1>}, {pipeline_mode = #tpu.pipeline_mode<synchronous>, transform_indices = @transform_2, window_bounds = array<i64: 20, 16>}, {pipeline_mode = #tpu.pipeline_mode<synchronous>, transform_indices = @transform_3, window_bounds = array<i64: 30, 24>}, {pipeline_mode = #tpu.pipeline_mode<synchronous>, transform_indices = @transform_4, window_bounds = array<i64: 16, 32>}, {pipeline_mode = #tpu.pipeline_mode<synchronous>, transform_indices = @transform_5, window_bounds = array<i64: 1, 32>}, {pipeline_mode = #tpu.pipeline_mode<synchronous>, transform_indices = @transform_6, window_bounds = array<i64: 32, 32>}, {pipeline_mode = #tpu.pipeline_mode<synchronous>, transform_indices = @transform_7, window_bounds = array<i64: 1, 32>}, {pipeline_mode = #tpu.pipeline_mode<synchronous>, transform_indices = @transform_8, window_bounds = array<i64: 24, 32>}, {pipeline_mode = #tpu.pipeline_mode<synchronous>, transform_indices = @transform_9, window_bounds = array<i64: 1, 32>}, {pipeline_mode = #tpu.pipeline_mode<synchronous>, transform_indices = @transform_10, window_bounds = array<i64: 32, 32>}, {pipeline_mode = #tpu.pipeline_mode<synchronous>, transform_indices = @transform_11, window_bounds = array<i64: 1, 32>}, {transform_indices = @transform_12, window_bounds = array<i64: 8, 32>}, {transform_indices = @transform_13, window_bounds = array<i64: 8, 32>}, {transform_indices = @transform_14, window_bounds = array<i64: 1, 8>}]} {
    %c0 = arith.constant 0 : index
    %c0_0 = arith.constant 0 : index
    %0 = vector.load %arg1[%c0, %c0_0] : memref<8x1xi32, #tpu.memory_space<vmem>>, vector<8x1xi32>
    %1 = tpu.iota {dimensions = array<i32: 1>} : vector<8x20xi32>
    %2 = vector.broadcast %0 : vector<8x1xi32> to vector<8x20xi32>
    %3 = arith.cmpi eq, %2, %1 : vector<8x20xi32>
    %4 = arith.extui %3 : vector<8x20xi1> to vector<8x20xi32>
    %5 = arith.sitofp %4 : vector<8x20xi32> to vector<8x20xf32>
    %c0_1 = arith.constant 0 : index
    %c0_2 = arith.constant 0 : index
    %6 = vector.load %arg2[%c0_1, %c0_2] : memref<8x1xi32, #tpu.memory_space<vmem>>, vector<8x1xi32>
    %7 = tpu.iota {dimensions = array<i32: 1>} : vector<8x30xi32>
    %8 = vector.broadcast %6 : vector<8x1xi32> to vector<8x30xi32>
    %9 = arith.cmpi eq, %8, %7 : vector<8x30xi32>
    %10 = arith.extui %9 : vector<8x30xi1> to vector<8x30xi32>
    %11 = arith.sitofp %10 : vector<8x30xi32> to vector<8x30xf32>
    %c0_3 = arith.constant 0 : index
    %c0_4 = arith.constant 0 : index
    %12 = vector.load %arg3[%c0_3, %c0_4] : memref<20x16xf32, #tpu.memory_space<vmem>>, vector<20x16xf32>
    %cst = arith.constant dense<0.000000e+00> : vector<8x16xf32>
    %13 = tpu.matmul %5, %12, %cst {dimension_numbers = #tpu.dot_dimension_numbers<[1], [0], [0], [1], [0, 0, 1, 1], [], []>} : vector<8x20xf32>, vector<20x16xf32>, vector<8x16xf32> -> vector<8x16xf32>
    %c0_5 = arith.constant 0 : index
    %c0_6 = arith.constant 0 : index
    %14 = vector.load %arg4[%c0_5, %c0_6] : memref<30x24xf32, #tpu.memory_space<vmem>>, vector<30x24xf32>
    %cst_7 = arith.constant dense<0.000000e+00> : vector<8x24xf32>
    %15 = tpu.matmul %11, %14, %cst_7 {dimension_numbers = #tpu.dot_dimension_numbers<[1], [0], [0], [1], [0, 0, 1, 1], [], []>} : vector<8x30xf32>, vector<30x24xf32>, vector<8x24xf32> -> vector<8x24xf32>
    %c0_8 = arith.constant 0 : index
    %c0_9 = arith.constant 0 : index
    %16 = vector.load %arg5[%c0_8, %c0_9] : memref<16x32xf32, #tpu.memory_space<vmem>>, vector<16x32xf32>
    %c0_10 = arith.constant 0 : index
    %c0_11 = arith.constant 0 : index
    %17 = vector.load %arg6[%c0_10, %c0_11] : memref<1x32xf32, #tpu.memory_space<vmem>>, vector<1x32xf32>
    %c0_12 = arith.constant 0 : index
    %c0_13 = arith.constant 0 : index
    %18 = vector.load %arg7[%c0_12, %c0_13] : memref<32x32xf32, #tpu.memory_space<vmem>>, vector<32x32xf32>
    %c0_14 = arith.constant 0 : index
    %c0_15 = arith.constant 0 : index
    %19 = vector.load %arg8[%c0_14, %c0_15] : memref<1x32xf32, #tpu.memory_space<vmem>>, vector<1x32xf32>
    %cst_16 = arith.constant dense<0.000000e+00> : vector<8x32xf32>
    %20 = tpu.matmul %13, %16, %cst_16 {dimension_numbers = #tpu.dot_dimension_numbers<[1], [0], [0], [1], [0, 0, 1, 1], [], []>} : vector<8x16xf32>, vector<16x32xf32>, vector<8x32xf32> -> vector<8x32xf32>
    %21 = vector.broadcast %17 : vector<1x32xf32> to vector<8x32xf32>
    %22 = arith.addf %20, %21 : vector<8x32xf32>
    %23 = arith.negf %22 : vector<8x32xf32>
    %24 = math.exp %23 : vector<8x32xf32>
    %cst_17 = arith.constant 1.000000e+00 : f32
    %25 = vector.broadcast %cst_17 : f32 to vector<8x32xf32>
    %26 = arith.addf %25, %24 : vector<8x32xf32>
    %27 = arith.divf %25, %26 : vector<8x32xf32>
    %cst_18 = arith.constant dense<0.000000e+00> : vector<8x32xf32>
    %28 = tpu.matmul %27, %18, %cst_18 {dimension_numbers = #tpu.dot_dimension_numbers<[1], [0], [0], [1], [0, 0, 1, 1], [], []>} : vector<8x32xf32>, vector<32x32xf32>, vector<8x32xf32> -> vector<8x32xf32>
    %29 = vector.broadcast %19 : vector<1x32xf32> to vector<8x32xf32>
    %30 = arith.addf %28, %29 : vector<8x32xf32>
    %31 = arith.mulf %30, %30 : vector<8x32xf32>
    %cst_19 = arith.constant dense<0.000000e+00> : vector<8xf32>
    %32 = vector.multi_reduction <add>, %31, %cst_19 [1] : vector<8x32xf32> to vector<8xf32>
    %33 = vector.shape_cast %32 : vector<8xf32> to vector<8x1xf32>
    %cst_20 = arith.constant 1.000000e-24 : f32
    %34 = vector.broadcast %cst_20 : f32 to vector<8x1xf32>
    %35 = arith.maximumf %33, %34 : vector<8x1xf32>
    %36 = math.rsqrt %35 : vector<8x1xf32>
    %37 = vector.broadcast %36 : vector<8x1xf32> to vector<8x32xf32>
    %38 = arith.mulf %30, %37 : vector<8x32xf32>
    %c0_21 = arith.constant 0 : index
    %c0_22 = arith.constant 0 : index
    %39 = vector.load %arg9[%c0_21, %c0_22] : memref<24x32xf32, #tpu.memory_space<vmem>>, vector<24x32xf32>
    %c0_23 = arith.constant 0 : index
    %c0_24 = arith.constant 0 : index
    %40 = vector.load %arg10[%c0_23, %c0_24] : memref<1x32xf32, #tpu.memory_space<vmem>>, vector<1x32xf32>
    %c0_25 = arith.constant 0 : index
    %c0_26 = arith.constant 0 : index
    %41 = vector.load %arg11[%c0_25, %c0_26] : memref<32x32xf32, #tpu.memory_space<vmem>>, vector<32x32xf32>
    %c0_27 = arith.constant 0 : index
    %c0_28 = arith.constant 0 : index
    %42 = vector.load %arg12[%c0_27, %c0_28] : memref<1x32xf32, #tpu.memory_space<vmem>>, vector<1x32xf32>
    %cst_29 = arith.constant dense<0.000000e+00> : vector<8x32xf32>
    %43 = tpu.matmul %15, %39, %cst_29 {dimension_numbers = #tpu.dot_dimension_numbers<[1], [0], [0], [1], [0, 0, 1, 1], [], []>} : vector<8x24xf32>, vector<24x32xf32>, vector<8x32xf32> -> vector<8x32xf32>
    %44 = vector.broadcast %40 : vector<1x32xf32> to vector<8x32xf32>
    %45 = arith.addf %43, %44 : vector<8x32xf32>
    %46 = arith.negf %45 : vector<8x32xf32>
    %47 = math.exp %46 : vector<8x32xf32>
    %cst_30 = arith.constant 1.000000e+00 : f32
    %48 = vector.broadcast %cst_30 : f32 to vector<8x32xf32>
    %49 = arith.addf %48, %47 : vector<8x32xf32>
    %50 = arith.divf %48, %49 : vector<8x32xf32>
    %cst_31 = arith.constant dense<0.000000e+00> : vector<8x32xf32>
    %51 = tpu.matmul %50, %41, %cst_31 {dimension_numbers = #tpu.dot_dimension_numbers<[1], [0], [0], [1], [0, 0, 1, 1], [], []>} : vector<8x32xf32>, vector<32x32xf32>, vector<8x32xf32> -> vector<8x32xf32>
    %52 = vector.broadcast %42 : vector<1x32xf32> to vector<8x32xf32>
    %53 = arith.addf %51, %52 : vector<8x32xf32>
    %54 = arith.mulf %53, %53 : vector<8x32xf32>
    %cst_32 = arith.constant dense<0.000000e+00> : vector<8xf32>
    %55 = vector.multi_reduction <add>, %54, %cst_32 [1] : vector<8x32xf32> to vector<8xf32>
    %56 = vector.shape_cast %55 : vector<8xf32> to vector<8x1xf32>
    %cst_33 = arith.constant 1.000000e-24 : f32
    %57 = vector.broadcast %cst_33 : f32 to vector<8x1xf32>
    %58 = arith.maximumf %56, %57 : vector<8x1xf32>
    %59 = math.rsqrt %58 : vector<8x1xf32>
    %60 = vector.broadcast %59 : vector<8x1xf32> to vector<8x32xf32>
    %61 = arith.mulf %53, %60 : vector<8x32xf32>
    %c0_34 = arith.constant 0 : index
    %c0_35 = arith.constant 0 : index
    %62 = vector.load %arg13[%c0_34, %c0_35] : memref<8x32xf32, #tpu.memory_space<vmem>>, vector<8x32xf32>
    tpu.vector_store %arg13[%c0_34, %c0_35], %38 {strides = array<i32>} : memref<8x32xf32, #tpu.memory_space<vmem>>, vector<8x32xf32>,
    %c0_36 = arith.constant 0 : index
    %c0_37 = arith.constant 0 : index
    %63 = vector.load %arg14[%c0_36, %c0_37] : memref<8x32xf32, #tpu.memory_space<vmem>>, vector<8x32xf32>
    tpu.vector_store %arg14[%c0_36, %c0_37], %61 {strides = array<i32>} : memref<8x32xf32, #tpu.memory_space<vmem>>, vector<8x32xf32>,
    %64 = arith.mulf %38, %61 : vector<8x32xf32>
    %cst_38 = arith.constant dense<0.000000e+00> : vector<8xf32>
    %65 = vector.multi_reduction <add>, %64, %cst_38 [1] : vector<8x32xf32> to vector<8xf32>
    %66 = arith.negf %65 : vector<8xf32>
    %67 = math.exp %66 : vector<8xf32>
    %cst_39 = arith.constant 1.000000e+00 : f32
    %68 = vector.broadcast %cst_39 : f32 to vector<8xf32>
    %69 = arith.addf %68, %67 : vector<8xf32>
    %70 = arith.divf %68, %69 : vector<8xf32>
    %71 = vector.shape_cast %70 : vector<8xf32> to vector<1x8xf32>
    %c0_40 = arith.constant 0 : index
    %c0_41 = arith.constant 0 : index
    %72 = vector.load %arg15[%c0_40, %c0_41] : memref<1x8xf32, #tpu.memory_space<vmem>>, vector<1x8xf32>
    tpu.vector_store %arg15[%c0_40, %c0_41], %71 {strides = array<i32>} : memref<1x8xf32, #tpu.memory_space<vmem>>, vector<1x8xf32>,
    return
  }
  func.func @transform_0(%arg0: i32) -> (i32, i32) {
    %c0_i32 = arith.constant 0 : i32
    %c0_i32_0 = arith.constant 0 : i32
    return %arg0, %c0_i32 : i32, i32
  }
  func.func @transform_1(%arg0: i32) -> (i32, i32) {
    %c0_i32 = arith.constant 0 : i32
    %c0_i32_0 = arith.constant 0 : i32
    return %arg0, %c0_i32 : i32, i32
  }
  func.func @transform_2(%arg0: i32) -> (i32, i32) {
    %c0_i32 = arith.constant 0 : i32
    %c0_i32_0 = arith.constant 0 : i32
    %c0_i32_1 = arith.constant 0 : i32
    return %c0_i32, %c0_i32_0 : i32, i32
  }
  func.func @transform_3(%arg0: i32) -> (i32, i32) {
    %c0_i32 = arith.constant 0 : i32
    %c0_i32_0 = arith.constant 0 : i32
    %c0_i32_1 = arith.constant 0 : i32
    return %c0_i32, %c0_i32_0 : i32, i32
  }
  func.func @transform_4(%arg0: i32) -> (i32, i32) {
    %c0_i32 = arith.constant 0 : i32
    %c0_i32_0 = arith.constant 0 : i32
    %c0_i32_1 = arith.constant 0 : i32
    return %c0_i32, %c0_i32_0 : i32, i32
  }
  func.func @transform_5(%arg0: i32) -> (i32, i32) {
    %c0_i32 = arith.constant 0 : i32
    %c0_i32_0 = arith.constant 0 : i32
    %c0_i32_1 = arith.constant 0 : i32
    return %c0_i32, %c0_i32_0 : i32, i32
  }
  func.func @transform_6(%arg0: i32) -> (i32, i32) {
    %c0_i32 = arith.constant 0 : i32
    %c0_i32_0 = arith.constant 0 : i32
    %c0_i32_1 = arith.constant 0 : i32
    return %c0_i32, %c0_i32_0 : i32, i32
  }
  func.func @transform_7(%arg0: i32) -> (i32, i32) {
    %c0_i32 = arith.constant 0 : i32
    %c0_i32_0 = arith.constant 0 : i32
    %c0_i32_1 = arith.constant 0 : i32
    return %c0_i32, %c0_i32_0 : i32, i32
  }
  func.func @transform_8(%arg0: i32) -> (i32, i32) {
    %c0_i32 = arith.constant 0 : i32
    %c0_i32_0 = arith.constant 0 : i32
    %c0_i32_1 = arith.constant 0 : i32
    return %c0_i32, %c0_i32_0 : i32, i32
  }
  func.func @transform_9(%arg0: i32) -> (i32, i32) {
    %c0_i32 = arith.constant 0 : i32
    %c0_i32_0 = arith.constant 0 : i32
    %c0_i32_1 = arith.constant 0 : i32
    return %c0_i32, %c0_i32_0 : i32, i32
  }
  func.func @transform_10(%arg0: i32) -> (i32, i32) {
    %c0_i32 = arith.constant 0 : i32
    %c0_i32_0 = arith.constant 0 : i32
    %c0_i32_1 = arith.constant 0 : i32
    return %c0_i32, %c0_i32_0 : i32, i32
  }
  func.func @transform_11(%arg0: i32) -> (i32, i32) {
    %c0_i32 = arith.constant 0 : i32
    %c0_i32_0 = arith.constant 0 : i32
    %c0_i32_1 = arith.constant 0 : i32
    return %c0_i32, %c0_i32_0 : i32, i32
  }
  func.func @transform_12(%arg0: i32) -> (i32, i32) {
    %c0_i32 = arith.constant 0 : i32
    %c0_i32_0 = arith.constant 0 : i32
    return %arg0, %c0_i32 : i32, i32
  }
  func.func @transform_13(%arg0: i32) -> (i32, i32) {
    %c0_i32 = arith.constant 0 : i32
    %c0_i32_0 = arith.constant 0 : i32
    return %arg0, %c0_i32 : i32, i32
  }
  func.func @transform_14(%arg0: i32) -> (i32, i32) {
    %c0_i32 = arith.constant 0 : i32
    %c0_i32_0 = arith.constant 0 : i32
    return %c0_i32, %arg0 : i32, i32
  }
}

</mosaic_0001>

<bundles_post_ra>
// kernel: mf_forward.1
= control target key start
LH: loop header
LB: loop body
LE: loop exit
PB: predicated region body
PF: predicated region fallthrough
CT: control target
= control target key end

     0   :  { %20 = vsyncpa [#allocation3], 0  ;;  %s1159_s0 = inlined_call_operand.vmem [shape: s32[8,1], index: 0, kind: input, shape index: {}]   ;;  %s1160_s1 = inlined_call_operand.vmem [shape: s32[8,1], index: 1, kind: input, shape index: {}]   ;;  %s1161_s2 = inlined_call_operand.vmem [shape: f32[20,16], index: 2, kind: input, shape index: {}]   ;;  %s1162_s3 = inlined_call_operand.vmem [shape: f32[30,24], index: 3, kind: input, shape index: {}]   ;;  %s1163_s4 = inlined_call_operand.vmem [shape: f32[16,32], index: 4, kind: input, shape index: {}]   ;;  %s1164_s5 = inlined_call_operand.hbm [shape: f32[1,32], index: 5, kind: input, shape index: {}]   ;;  %s1165_s6 = inlined_call_operand.vmem [shape: f32[32,32], index: 6, kind: input, shape index: {}]   ;;  %s1166_s7 = inlined_call_operand.vmem [shape: f32[1,32], index: 7, kind: input, shape index: {}]   ;;  %s1167_s8 = inlined_call_operand.vmem [shape: f32[24,32], index: 8, kind: input, shape index: {}]   ;;  %s1168_s9 = inlined_call_operand.hbm [shape: f32[1,32], index: 9, kind: input, shape index: {}]   ;;  %s1169_s10 = inlined_call_operand.vmem [shape: f32[32,32], index: 10, kind: input, shape index: {}]   ;;  %s1170_s11 = inlined_call_operand.hbm [shape: f32[1,32], index: 11, kind: input, shape index: {}]   ;;  %s1171_s12 = inlined_call_operand.hbm [shape: f32[8,32], index: 12, kind: output, shape index: {0}]   ;;  %s1172_s13 = inlined_call_operand.hbm [shape: f32[8,32], index: 13, kind: output, shape index: {1}]   ;;  %s1173_s14 = inlined_call_operand.hbm [shape: f32[1,8], index: 14, kind: output, shape index: {2}]  }
   0x1   :  { %21 = vsyncpa [#allocation6], 0 }
   0x2   :  { %22 = vsyncpa [#allocation4], 0 }
   0x3   :  { %23 = vsyncpa [#allocation10], 0  ;;  %s940_s29 = smov [#allocation5]   ;;  %s941_s15 = smov [#allocation2]  }
   0x4   :  { %s56_s30 = sshll.u32 %s940_s29, 4  ;;  %s40_s16 = sshll.u32 %s941_s15, 4  ;;  %s57_s30 = int_to_ptr.vmem [resolvable:$true] %s56_s30  ;;  %s41_s16 = int_to_ptr.vmem [resolvable:$true] %s40_s16 }
   0x5   :  { %s820_s17 = scalar_lea.vmem %s57_s30, 16  ;;  %s824_s18 = scalar_lea.vmem %s57_s30, 32 }
   0x6   :  { %p821_p0 = scmp.ne.s32.totalorder %s57_s30, %s820_s17  ;;  %p825_p1 = scmp.lt.s32.totalorder %s57_s30, %s57_s30 }
   0x7   :  { %p826_p2 = scmp.lt.s32.totalorder %s824_s18, %s820_s17 }
   0x9   :  { %p827_p3 = por %p826_p2, %p825_p1 }
   0xb   :  { %p828_p4 = pnand %p827_p3, %p821_p0 }
   0xd   :  { %831 = shalt.err (!%p828_p4)
}
   0xe   :  { %59 = dma.hbm_to_vmem [thread:$0]  %s1168_s9, 16, %s57_s30, [#allocation6]  }
   0xf   :  { %s840_s21 = scalar_lea.vmem %s41_s16, 16  ;;  %s844_s22 = scalar_lea.vmem %s41_s16, 32 }
  0x10   :  { %p841_p5 = scmp.ne.s32.totalorder %s41_s16, %s840_s21  ;;  %p845_p6 = scmp.lt.s32.totalorder %s41_s16, %s41_s16 }
  0x11   :  { %p846_p7 = scmp.lt.s32.totalorder %s844_s22, %s840_s21 }
  0x13   :  { %p847_p8 = por %p846_p7, %p845_p6 }
  0x15   :  { %p848_p9 = pnand %p847_p8, %p841_p5 }
  0x17   :  { %851 = shalt.err (!%p848_p9)
}
  0x18   :  { %43 = dma.hbm_to_vmem [thread:$0]  %s1164_s5, 16, %s41_s16, [#allocation3]  }
  0x19   :  { %s942_s25 = smov [#allocation7]  }
  0x1a   :  { %s68_s26 = sshll.u32 %s942_s25, 4  ;;  %s69_s26 = int_to_ptr.vmem [resolvable:$true] %s68_s26 }
  0x1b   :  { %s860_s27 = scalar_lea.vmem %s69_s26, 16  ;;  %s864_s28 = scalar_lea.vmem %s69_s26, 32 }
  0x1c   :  { %p861_p10 = scmp.ne.s32.totalorder %s69_s26, %s860_s27  ;;  %p865_p11 = scmp.lt.s32.totalorder %s69_s26, %s69_s26 }
  0x1d   :  { %p866_p12 = scmp.lt.s32.totalorder %s864_s28, %s860_s27 }
  0x1f   :  { %p867_p13 = por %p866_p12, %p865_p11 }
  0x21   :  { %p868_p0 = pnand %p867_p13, %p861_p10 }
  0x23   :  { %871 = shalt.err (!%p868_p0)
}
  0x24   :  { %71 = dma.hbm_to_vmem [thread:$0]  %s1170_s11, 16, %s69_s26, [#allocation6]  }
  0x25   :  { %932 = dma.done.wait [#allocation3], 16  }
  0x26   :  { %933 = vsyncadd [#allocation3], 4294967280 }
  0x27   :  { %934 = dma.done.wait [#allocation6], 32  }
  0x28   :  { %935 = vsyncadd [#allocation6], 4294967264  ;;  %v943_v0 = vmov 0   ;;  %v944_v1 = vmov 0.0   ;;  %vm104_vm0 = vcmask 1043456   ;;  %vm945_vm1 = vmmov 0  }
  0x29   :  { %795 = vset.pattern.permute.xlu0 %v943_v0  ;;  %728 = vmatprep.subr.mxu0 %v944_v1  ;;  %vm186_vm2 = vcmask 1045504   ;;  %v81_v2 = vld [vmem:[%s1159_s0] sm:$0xff]  ;;  %v99_v3 = vld [vmem:[%s1161_s2 + $0x10] sm:$0xf]  ;;  %v98_v4 = vld [vmem:[%s1161_s2 + $0x8] sm:$0xff]  ;;  %v82_v11 = vlaneseq  ;;  %vm100_vm3 = vcmask 162816  }
  0x2a   :  { %737 = vmatprep.subr.mxu1 %v944_v1  ;;  %734 = vmatprep.mubr.msk.f32.mxu0 %vm945_vm1, %v944_v1  ;;  %v181_v5 = vld [vmem:[%s1162_s3 + $0x18] sm:$0x3f]  ;;  %v90_v6 = vld [vmem:[%s1160_s1] sm:$0xff]  ;;  %v180_v8 = vld [vmem:[%s1162_s3 + $0x10] sm:$0xff]  ;;  %vm182_vm5 = vcmask 244736   ;;  %vm274_vm7 = vcmask 130048  }
  0x2b   :  { %745 = vmatprep.mubr.msk.f32.mxu1 %vm945_vm1, %v944_v1  ;;  %85 = vperm.xlu0 %795, %v81_v2   ;;  %v97_v7 = vld [vmem:[%s1161_s2] sm:$0xff]  ;;  %v179_v9 = vld [vmem:[%s1162_s3 + $0x8] sm:$0xff]  ;;  %v1074_v12 = vand.u32 127, %v82_v11  ;;  %v443_v19 = vld [vmem:[%s1167_s8 + $0x10] sm:$0xff]  ;;  %vm456_vm8 = vcmask 195584   ;;  %vm360_vm9 = vcmask 261120  }
  0x2c   :  { %729 = vmatpush3.msk.msra.mxu0 %vm104_vm0, %v99_v3  ;;  %738 = vmatpush3.msk.msra.mxu1 %vm186_vm2, %v181_v5  ;;  %v178_v10 = vld [vmem:[%s1162_s3] sm:$0xff]  ;;  %v261_v16 = vld [vmem:[%s1163_s4 + $0x8] sm:$0xff]  ;;  %v266_v26 = vld [vmem:[%s1165_s6 + $0x18] sm:$0xff]  ;;  %s947_s28 = smov [#allocation8]  }
  0x2d   :  { %730 = vmatprep.subr.mxu0 %v944_v1  ;;  %739 = vmatprep.subr.mxu1 %v944_v1  ;;  %v260_v18 = vld [vmem:[%s1163_s4] sm:$0xff]  ;;  %v442_v20 = vld [vmem:[%s1167_s8 + $0x8] sm:$0xff]  ;;  %v265_v27 = vld [vmem:[%s1165_s6 + $0x10] sm:$0xff]  ;;  %s648_s9 = sshll.u32 %s947_s28, 4  ;;  %s649_s9 = int_to_ptr.vmem [resolvable:$true] %s648_s9 }
  0x2e   :  { %731 = vmatpush3.msra.mxu0 %v98_v4  ;;  %740 = vmatpush3.msra.mxu1 %v180_v8  ;;  %v441_v21 = vld [vmem:[%s1167_s8] sm:$0xff]  ;;  %v448_v28 = vld [vmem:[%s1169_s10 + $0x18] sm:$0xff]  ;;  %v447_v29 = vld [vmem:[%s1169_s10 + $0x10] sm:$0xff] }
  0x2f   :  { %732 = vmatprep.subr.mxu0 %v944_v1  ;;  %92 = vperm.xlu0 %795, %v90_v6   ;;  %v264_v30 = vld [vmem:[%s1165_s6 + $0x8] sm:$0xff]  ;;  %v263_v31 = vld [vmem:[%s1165_s6] sm:$0xff] }
  0x30   :  { %733 = vmatpush3.msra.mxu0 %v97_v7  ;;  %741 = vmatprep.subr.mxu1 %v944_v1  ;;  %v446_v32 = vld [vmem:[%s1169_s10 + $0x8] sm:$0xff]  ;;  %v445_v33 = vld [vmem:[%s1169_s10] sm:$0xff] }
  0x31   :  { %766 = vmatprep.subr.mxu0 %v944_v1  ;;  %742 = vmatpush3.msra.mxu1 %v179_v9  ;;  %v691_v34 = vld [vmem:[#allocation2] ss:$0 sm:$0xff]  ;;  %v696_v38 = vld [vmem:[#allocation5] ss:$0 sm:$0xff]  ;;  %v699_v54 = vld [vmem:[#allocation7] ss:$0 sm:$0xff] }
  0x32   :  { %743 = vmatprep.subr.mxu1 %v944_v1  ;;  %v694_v50 = vld [vmem:[%s1166_s7] ss:$0 sm:$0xff]  ;;  %s946_s7 = smov [#allocation9]  }
  0x33   :  { %744 = vmatpush3.msra.mxu1 %v178_v10  ;;  %s658_s27 = sshll.u32 %s946_s7, 4  ;;  %s659_s27 = int_to_ptr.vmem [resolvable:$true] %s658_s27 }
  0x34   :  { %748 = vmatprep.subr.mxu1 %v944_v1  ;;  %s872_s29 = scalar_lea.vmem %s659_s27, 128  ;;  %p877_p2 = scmp.lt.s32.totalorder %s659_s27, %s659_s27 }
  0x35   :  { %p873_p1 = scmp.ne.s32.totalorder %s659_s27, %s872_s29  ;;  %p878_p3 = scmp.lt.s32.totalorder %s872_s29, %s872_s29 }
  0x37   :  { %p879_p4 = por %p878_p3, %p877_p2 }
  0x39   :  { %p880_p5 = pnand %p879_p4, %p873_p1 }
  0xa6   :  { %v86_v13 = vpop.permute.xlu0 %85 }
  0xa7   :  { %vm87_vm4 = vcmp.eq.s32.totalorder %v86_v13, %v1074_v12 }
  0xa8   :  { %v685_v14 = vsel %vm87_vm4, 1.0, %v944_v1 }
  0xa9   :  { %735 = vmatmul.mubr.msk.f32.vlgmr.msra.gmra.mxu0 %vm100_vm3, %v685_v14 }
  0xaa   :  { %v93_v15 = vpop.permute.xlu0 %92  ;;  %772 = vmatprep.mubr.msk.f32.mxu0 %vm945_vm1, %v944_v1  ;;  %767 = vmatpush3.msra.mxu0 %v443_v19 }
  0xab   :  { %vm94_vm6 = vcmp.eq.s32.totalorder %v93_v15, %v1074_v12  ;;  %768 = vmatprep.subr.mxu0 %v944_v1 }
  0xac   :  { %v686_v17 = vsel %vm94_vm6, 1.0, %v944_v1  ;;  %769 = vmatpush3.msra.mxu0 %v442_v20 }
  0xad   :  { %746 = vmatmul.mubr.msk.f32.vlgmr.msra.gmra.mxu1 %vm182_vm5, %v686_v17  ;;  %770 = vmatprep.subr.mxu0 %v944_v1 }
  0xae   :  { %749 = vmatpush3.msra.mxu1 %v261_v16  ;;  %752 = vmatprep.mubr.msk.f32.mxu1 %vm945_vm1, %v944_v1 }
  0xaf   :  { %750 = vmatprep.subr.mxu1 %v944_v1  ;;  %771 = vmatpush3.msra.mxu0 %v441_v21 }
  0xb0   :  { %751 = vmatpush3.msra.mxu1 %v260_v18  ;;  %775 = vmatprep.subr.mxu0 %v944_v1 }
  0xb1   :  { %755 = vmatprep.subr.mxu1 %v944_v1 }
 0x169   :  { %v174_v22 = vpop.f32.mrf.mxu0 }
 0x16a   :  { %753 = vmatmul.mubr.msk.f32.vlgmr.msra.gmra.mxu1 %vm274_vm7, %v174_v22 }
 0x16b   :  { %v736_v23 = vpop.f32.mrf.mxu0  ;;  %763 = vmatprep.mubr.msk.f32.mxu1 %vm945_vm1, %v944_v1  ;;  %756 = vmatpush3.msra.mxu1 %v266_v26 }
 0x16c   :  { %757 = vmatprep.subr.mxu1 %v944_v1 }
 0x16d   :  { %v256_v24 = vpop.f32.mrf.mxu1  ;;  %758 = vmatpush3.msra.mxu1 %v265_v27 }
 0x16e   :  { %773 = vmatmul.mubr.msk.f32.vlgmr.msra.gmra.mxu0 %vm456_vm8, %v256_v24  ;;  %759 = vmatprep.subr.mxu1 %v944_v1 }
 0x16f   :  { %v747_v25 = vpop.f32.mrf.mxu1  ;;  %783 = vmatprep.mubr.msk.f32.mxu0 %vm945_vm1, %v944_v1  ;;  %776 = vmatpush3.msra.mxu0 %v448_v28 }
 0x170   :  { %777 = vmatprep.subr.mxu0 %v944_v1  ;;  %760 = vmatpush3.msra.mxu1 %v264_v30 }
 0x171   :  { %778 = vmatpush3.msra.mxu0 %v447_v29  ;;  %761 = vmatprep.subr.mxu1 %v944_v1 }
 0x172   :  { %779 = vmatprep.subr.mxu0 %v944_v1  ;;  %762 = vmatpush3.msra.mxu1 %v263_v31 }
 0x173   :  { %780 = vmatpush3.msra.mxu0 %v446_v32 }
 0x174   :  { %781 = vmatprep.subr.mxu0 %v944_v1 }
 0x175   :  { %782 = vmatpush3.msra.mxu0 %v445_v33 }
 0x22a   :  { %v344_v35 = vpop.f32.mrf.mxu1 }
 0x22b   :  { %v345_v36 = vadd.f32 %v691_v34, %v344_v35 }
 0x22c   :  { %v754_v37 = vpop.f32.mrf.mxu1 }
 0x22d   :  { %v693_v39 = vmul.f32 -1.442695, %v345_v36 }
 0x22e   :  { %v526_v40 = vpop.f32.mrf.mxu0 }
 0x22f   :  { %796 = vpow2.f32 %v693_v39  ;;  %v527_v41 = vadd.f32 %v696_v38, %v526_v40 }
 0x230   :  { %v774_v42 = vpop.f32.mrf.mxu0 }
 0x231   :  { %v698_v43 = vmul.f32 -1.442695, %v527_v41 }
 0x233   :  { %798 = vpow2.f32 %v698_v43 }
 0x23c   :  { %v797_v44 = vpop.eup %796 }
 0x23d   :  { %v351_v45 = vadd.f32 1.0, %v797_v44 }
 0x23f   :  { %800 = vrcp.f32 %v351_v45 }
 0x240   :  { %v799_v46 = vpop.eup %798 }
 0x241   :  { %v533_v47 = vadd.f32 1.0, %v799_v46 }
 0x243   :  { %802 = vrcp.f32 %v533_v47 }
 0x24c   :  { %v801_v48 = vpop.eup %800 }
 0x24d   :  { %764 = vmatmul.mubr.msk.f32.vlgmr.msra.gmra.mxu1 %vm360_vm9, %v801_v48 }
 0x250   :  { %v803_v49 = vpop.eup %802 }
 0x251   :  { %784 = vmatmul.mubr.msk.f32.vlgmr.msra.gmra.mxu0 %vm360_vm9, %v803_v49 }
 0x30d   :  { %v430_v51 = vpop.f32.mrf.mxu1 }
 0x30e   :  { %v431_v52 = vadd.f32 %v694_v50, %v430_v51 }
 0x30f   :  { %v765_v53 = vpop.f32.mrf.mxu1 }
 0x310   :  { %v434_v55 = vmul.f32 %v431_v52, %v431_v52 }
 0x311   :  { %v611_v56 = vpop.f32.mrf.mxu0 }
 0x312   :  { %v612_v57 = vadd.f32 %v699_v54, %v611_v56  ;;  %v435_v58 = vsel %vm360_vm9, %v434_v55, 0.0 }
 0x313   :  { %v785_v59 = vpop.f32.mrf.mxu0  ;;  %436 = vadd.xlane.f32.xlu1 %v435_v58 }
 0x314   :  { %v615_v60 = vmul.f32 %v612_v57, %v612_v57 }
 0x316   :  { %v616_v61 = vsel %vm360_vm9, %v615_v60, 0.0 }
 0x317   :  { %617 = vadd.xlane.f32.xlu1 %v616_v61 }
 0x39c   :  { %v437_v62 = vpop.xlane.xlu1 %436 }
 0x39d   :  { %v438_v63 = vmax.f32 %v437_v62, 1e-24 }
 0x39f   :  { %804 = vrsqrt.f32 %v438_v63 }
 0x3a0   :  { %v618_v0 = vpop.xlane.xlu1 %617 }
 0x3a1   :  { %v619_v1 = vmax.f32 %v618_v0, 1e-24 }
 0x3a3   :  { %806 = vrsqrt.f32 %v619_v1 }
 0x3ac   :  { %v805_v2 = vpop.eup %804 }
 0x3ad   :  { %v440_v3 = vmul.f32 %v805_v2, %v431_v52 }
 0x3af   :  { %622 = vst.msk [vmem:[#allocation8] sm:$0xff] %vm360_vm9, %v440_v3 }
 0x3b0   :  { %v807_v4 = vpop.eup %806 }
 0x3b1   :  { %v621_v5 = vmul.f32 %v807_v4, %v612_v57 }
 0x3b3   :  { %v624_v6 = vmul.f32 %v621_v5, %v440_v3  ;;  %623 = vst.msk [vmem:[#allocation9] sm:$0xff] %vm360_vm9, %v621_v5 }
 0x3b5   :  { %v625_v7 = vsel %vm360_vm9, %v624_v6, 0.0 }
 0x3b6   :  { %626 = vadd.xlane.f32.xlu0 %v625_v7 }
 0x3b7   :  { %883 = shalt.err (!%p880_p5)
}
 0x3b8   :  { %661 = dma.vmem_to_hbm [thread:$0]  %s659_s27, 128, %s1172_s13, [#allocation10]  }
 0x3b9   :  { %s892_s30 = scalar_lea.vmem %s649_s9, 128  ;;  %p897_p7 = scmp.lt.s32.totalorder %s649_s9, %s649_s9 }
 0x3ba   :  { %p893_p6 = scmp.ne.s32.totalorder %s649_s9, %s892_s30  ;;  %p898_p8 = scmp.lt.s32.totalorder %s892_s30, %s892_s30 }
 0x3bc   :  { %p899_p9 = por %p898_p8, %p897_p7 }
 0x3be   :  { %p900_p10 = pnand %p899_p9, %p893_p6 }
 0x3c0   :  { %903 = shalt.err (!%p900_p10)
}
 0x3c1   :  { %651 = dma.vmem_to_hbm [thread:$0]  %s649_s9, 128, %s1171_s12, [#allocation4]   ;;  %v636_v14 = vshrl.u32 %v82_v11, 7  ;;  %vm640_vm10 = vcmask 57344  }
 0x3c2   :  { %s948_s13 = smov [#allocation11]  }
 0x3c3   :  { %v637_v15 = vsub.s32 %v1074_v12, %v636_v14  ;;  %s668_s16 = sshll.u32 %s948_s13, 4  ;;  %s669_s16 = int_to_ptr.vmem [resolvable:$true] %s668_s16 }
 0x3c4   :  { %s912_s17 = scalar_lea.vmem %s669_s16, 16  ;;  %s916_s12 = scalar_lea.vmem %s669_s16, 32 }
 0x3c5   :  { %p913_p11 = scmp.ne.s32.totalorder %s669_s16, %s912_s17  ;;  %p917_p12 = scmp.lt.s32.totalorder %s669_s16, %s669_s16 }
 0x3c6   :  { %p918_p13 = scmp.lt.s32.totalorder %s916_s12, %s912_s17 }
 0x3c8   :  { %p919_p0 = por %p918_p13, %p917_p12 }
 0x3ca   :  { %p920_p1 = pnand %p919_p0, %p913_p11 }
 0x43f   :  { %v627_v8 = vpop.xlane.xlu0 %626 }
 0x440   :  { %v701_v9 = vmul.f32 -1.442695, %v627_v8 }
 0x442   :  { %808 = vpow2.f32 %v701_v9 }
 0x44f   :  { %v809_v10 = vpop.eup %808 }
 0x450   :  { %v631_v13 = vadd.f32 1.0, %v809_v10 }
 0x452   :  { %810 = vrcp.f32 %v631_v13 }
 0x45f   :  { %v811_v16 = vpop.eup %810 }
 0x460   :  { %v638_v17 = vrot.slane %v811_v16, %v637_v15 }
 0x462   :  { %641 = vst.msk [vmem:[#allocation11] sm:$0x1] %vm640_vm10, %v638_v17 }
 0x463   :  { %923 = shalt.err (!%p920_p1)
}
 0x464   :  { %671 = dma.vmem_to_hbm [thread:$0]  %s669_s16, 16, %s1173_s14, [#allocation10]  }
 0x465   :  { %936 = dma.done.wait [#allocation4], 128  }
 0x466   :  { %937 = vsyncadd [#allocation4], 4294967168 }
 0x467   :  { %938 = dma.done.wait [#allocation10], 144  }
 0x468   :  { %939 = vsyncadd [#allocation10], 4294967152 }
 0x469   :  { %681 = vsyncpa [#allocation3], 1 }
 0x46a   :  { %682 = vsyncpa [#allocation6], 1 }
 0x46b   :  { %683 = vsyncpa [#allocation4], 1 }
 0x46c   :  { %684 = vsyncpa [#allocation10], 1 }

</bundles_post_ra>
